<compile_context>
chip_gen: v7x
topology: tpu7x:2x2x1
jax: 0.10.0
libtpu: 0.0.40
codegen_flags: <defaults>
</compile_context>

<pallas_src>
import functools

import jax
import jax.numpy as jnp
from jax import lax
from jax.experimental import pallas as pl
from jax.experimental.pallas import tpu as pltpu


def _round_up(x: int, m: int) -> int:
    return (x + m - 1) // m * m


def _make_kernel(K: int, S: int, p: int, Ho: int, L_in: int):
    def kernel(x_ref, wtap_ref, mix_ref, bias_ref, o_ref):
        # x_ref   : VMEM (1, Hp, L_in)    lane-packed, vertically zero-padded input
        # wtap_ref: VMEM (K*K, 1, L_in)   per-tap masked depthwise lane weights
        # mix_ref : VMEM (L_in, L_out)    pointwise*BN-scale mixing / relayout matrix
        # bias_ref: VMEM (1, L_out)       folded BN bias per output lane
        # o_ref   : VMEM (1, Ho, L_out)   lane-dense output slab
        x = x_ref[0]                       # (Hp, L_in)
        wt = wtap_ref[...]                 # (K*K, 1, L_in)

        # Depthwise: K*K full-lane FMAs; one lane-roll per horizontal tap offset.
        acc = None
        for kw in range(K):
            shift = (p - kw) % L_in
            xs = pltpu.roll(x, shift=shift, axis=1) if shift else x
            for kh in range(K):
                if S == 1:
                    rows = xs[kh:kh + Ho, :]
                else:
                    # TODO(synk): for stride>1, pre-decimate rows in the wrapper
                    # packing instead of a strided in-register slice per tap.
                    rows = lax.slice(xs, (kh, 0),
                                     (kh + (Ho - 1) * S + 1, L_in), (S, 1))
                term = rows * wt[kh * K + kw]          # (Ho,L_in) * (1,L_in)
                acc = term if acc is None else acc + term

        # Pointwise + BN-scale + channel (cross-lane) sum + stride decimation +
        # relayout, all in one small MXU matmul.
        y = jnp.dot(acc, mix_ref[...],
                    preferred_element_type=jnp.float32,
                    precision=lax.Precision.HIGHEST)   # (Ho, L_out)

        # Folded BN bias + ReLU; single full-lane store.
        o_ref[0] = jnp.maximum(y + bias_ref[...], 0.0)

    return kernel


def separable_conv2d(x_nchw, wd_torch, wp_torch, gamma, beta, run_mean,
                     run_var, *, stride: int = 1, padding: int = 0,
                     eps: float = 1e-5):
    """x_nchw: (N, Cin, H, W) f32.  Returns (N, Cout, Ho, Wo) f32 (eval-mode BN)."""
    N, Cin, H, W = x_nchw.shape
    K = wd_torch.shape[-1]
    Cout = wp_torch.shape[0]
    S, p = stride, padding
    Hp, Wp = H + 2 * p, W + 2 * p
    Ho = (Hp - K) // S + 1
    Wo = (Wp - K) // S + 1

    # Images packed into the 128-lane dimension per grid step.  For tiny NASNet
    # stems this collapses the whole batch into a single grid step (no per-step
    # overhead on single-TC v5e/v6e); for larger problems NB -> 1 and the grid
    # stays a "parallel" batch axis so v7x's two TensorCores each take a share.
    NB = max(1, min(N, 128 // max(1, Cin * W)))
    while N % NB:
        NB -= 1
    G = N // NB
    Lr = NB * Cin * W                      # real input lanes  (image, chan, col)
    L_in = _round_up(Lr, 128)
    Lo = NB * Cout * Wo                    # real output lanes (image, ochan, col)
    L_out = _round_up(Lo, 128)

    x = x_nchw.astype(jnp.float32)
    # Lane-packed input (single fused transpose+pad; vertical halo included,
    # horizontal halo folded into the tap-weight masks below).
    xp = jnp.transpose(x.reshape(G, NB, Cin, H, W), (0, 3, 1, 2, 4))
    xp = xp.reshape(G, H, Lr)
    xp = jnp.pad(xp, ((0, 0), (p, p), (0, L_in - Lr)))          # (G, Hp, L_in)

    # Per-tap masked lane weights: wtap[kh*K+kw, 0, (nb,c,w)] = wd[c,kh,kw] when
    # column w+kw-p stays inside the row (folds the horizontal zero padding).
    wd = wd_torch[:, 0].astype(jnp.float32)                     # (Cin, K, K)
    col = jnp.arange(W)[None, :]
    kwi = jnp.arange(K)[:, None]
    hmask = ((col + kwi - p >= 0) & (col + kwi - p < W)).astype(jnp.float32)  # (K, W)
    wtap = (jnp.transpose(wd, (1, 2, 0))[:, :, None, :, None]   # (kh,kw,1,c,1)
            * hmask[None, :, None, None, :])                    # (1,kw,1,1,w)
    wtap = jnp.broadcast_to(wtap, (K, K, NB, Cin, W)).reshape(K * K, Lr)
    wtap = jnp.pad(wtap, ((0, 0), (0, L_in - Lr))).reshape(K * K, 1, L_in)

    # Mixing matrix for the MXU: mix[(nb,c,w),(nb,co,wo)] = wps[co,c]*[w==wo*S],
    # block-diagonal over packed images.  (Could be built once per layer.)
    scale = (gamma / jnp.sqrt(run_var + eps)).astype(jnp.float32)          # (Cout,)
    wps = wp_torch[:, :, 0, 0].astype(jnp.float32) * scale[:, None]        # (Cout, Cin)
    sel = (jnp.arange(W)[:, None] == jnp.arange(Wo)[None, :] * S).astype(jnp.float32)
    mix = (jnp.eye(NB, dtype=jnp.float32)[:, None, None, :, None, None]
           * wps.T[None, :, None, None, :, None]
           * sel[None, None, :, None, None, :])                 # (NB,Cin,W,NB,Cout,Wo)
    mix = mix.reshape(Lr, Lo)
    mix = jnp.pad(mix, ((0, L_in - Lr), (0, L_out - Lo)))       # (L_in, L_out)

    bias = (beta - run_mean * scale).astype(jnp.float32)                    # (Cout,)
    bvec = jnp.broadcast_to(bias[None, :, None], (NB, Cout, Wo)).reshape(1, Lo)
    bvec = jnp.pad(bvec, ((0, 0), (0, L_out - Lo)))             # (1, L_out)

    kernel = _make_kernel(K, S, p, Ho, L_in)

    out = pl.pallas_call(
        kernel,
        out_shape=jax.ShapeDtypeStruct((G, Ho, L_out), jnp.float32),
        grid_spec=pltpu.PrefetchScalarGridSpec(
            num_scalar_prefetch=0,
            grid=(G,),
            in_specs=[
                pl.BlockSpec((1, Hp, L_in), lambda g: (g, 0, 0)),      # xp
                pl.BlockSpec((K * K, 1, L_in), lambda g: (0, 0, 0)),   # wtap
                pl.BlockSpec((L_in, L_out), lambda g: (0, 0)),         # mix
                pl.BlockSpec((1, L_out), lambda g: (0, 0)),            # bias
            ],
            out_specs=pl.BlockSpec((1, Ho, L_out), lambda g: (g, 0, 0)),
        ),
        compiler_params=pltpu.CompilerParams(
            dimension_semantics=("parallel",),
        ),
    )(xp, wtap, mix, bvec)

    # Un-pack lanes -> NCHW (one small transpose on the output).
    out = out[:, :, :Lo].reshape(G, Ho, NB, Cout, Wo)
    return jnp.transpose(out, (0, 2, 3, 1, 4)).reshape(N, Cout, Ho, Wo)


def _reference(x_nchw, wd_torch, wp_torch, gamma, beta, run_mean, run_var,
               *, stride, padding, eps=1e-5):
    dn = ("NCHW", "OIHW", "NCHW")
    dwa = lax.conv_general_dilated(
        x_nchw, wd_torch, window_strides=(stride, stride),
        padding=[(padding, padding), (padding, padding)],
        feature_group_count=x_nchw.shape[1], dimension_numbers=dn,
        precision=lax.Precision.HIGHEST)
    pwa = lax.conv_general_dilated(
        dwa, wp_torch, window_strides=(1, 1), padding=[(0, 0), (0, 0)],
        dimension_numbers=dn, precision=lax.Precision.HIGHEST)
    scale = gamma / jnp.sqrt(run_var + eps)
    bias = beta - run_mean * scale
    y = pwa * scale[None, :, None, None] + bias[None, :, None, None]
    return jnp.maximum(y, 0.0)


if __name__ == "__main__":
    # Module config: SeparableConv2d(in_channels=4, out_channels=8,
    #                                kernel_size=3, stride=1, padding=1)
    N, Cin, Cout, H, W = 2, 4, 8, 16, 16
    K, stride, padding = 3, 1, 1

    key = jax.random.PRNGKey(0)
    kx, kd, kp, kg, kb, km, kv = jax.random.split(key, 7)

    x = jax.random.normal(kx, (N, Cin, H, W), jnp.float32)
    # PyTorch parameter shapes:
    wd_torch = jax.random.normal(kd, (Cin, 1, K, K), jnp.float32) * 0.2     # depthwise
    wp_torch = jax.random.normal(kp, (Cout, Cin, 1, 1), jnp.float32) * 0.2  # pointwise
    gamma = 1.0 + 0.1 * jax.random.normal(kg, (Cout,), jnp.float32)
    beta = 0.1 * jax.random.normal(kb, (Cout,), jnp.float32)
    run_mean = 0.1 * jax.random.normal(km, (Cout,), jnp.float32)
    run_var = jnp.abs(jax.random.normal(kv, (Cout,), jnp.float32)) + 0.5

    fn = jax.jit(functools.partial(separable_conv2d, stride=stride,
                                   padding=padding))
    out = jax.block_until_ready(
        fn(x, wd_torch, wp_torch, gamma, beta, run_mean, run_var))

    ref = _reference(x, wd_torch, wp_torch, gamma, beta, run_mean, run_var,
                     stride=stride, padding=padding)
    assert out.shape == (N, Cout, H, W), out.shape
    max_err = float(jnp.max(jnp.abs(out - ref)))
    assert jnp.allclose(out, ref, atol=2e-3, rtol=2e-3), max_err

    print("KERNEL_OK")
</pallas_src>

<mosaic_0001>
module attributes {stable_mosaic.version = 11 : i64} {
  func.func @kernel(%arg0: i32, %arg1: memref<1x18x128xf32, #tpu.memory_space<vmem>>, %arg2: memref<9x1x128xf32, #tpu.memory_space<vmem>>, %arg3: memref<128x256xf32, #tpu.memory_space<vmem>>, %arg4: memref<1x256xf32, #tpu.memory_space<vmem>>, %arg5: memref<1x16x256xf32, #tpu.memory_space<vmem>>) attributes {dimension_semantics = [#tpu.dimension_semantics<parallel>], iteration_bounds = array<i64: 1>, scalar_prefetch = 0 : i64, scratch_operands = 0 : i64, tpu.core_type = #tpu.core_type<tc>, window_params = [{transform_indices = @transform_0, window_bounds = array<i64: 1, 18, 128>}, {pipeline_mode = #tpu.pipeline_mode<synchronous>, transform_indices = @transform_1, window_bounds = array<i64: 9, 1, 128>}, {pipeline_mode = #tpu.pipeline_mode<synchronous>, transform_indices = @transform_2, window_bounds = array<i64: 128, 256>}, {pipeline_mode = #tpu.pipeline_mode<synchronous>, transform_indices = @transform_3, window_bounds = array<i64: 1, 256>}, {transform_indices = @transform_4, window_bounds = array<i64: 1, 16, 256>}]} {
    %c0 = arith.constant 0 : index
    %c0_0 = arith.constant 0 : index
    %c0_1 = arith.constant 0 : index
    %0 = vector.load %arg1[%c0, %c0_0, %c0_1] : memref<1x18x128xf32, #tpu.memory_space<vmem>>, vector<1x18x128xf32>
    %1 = vector.shape_cast %0 : vector<1x18x128xf32> to vector<18x128xf32>
    %c0_2 = arith.constant 0 : index
    %c0_3 = arith.constant 0 : index
    %c0_4 = arith.constant 0 : index
    %2 = vector.load %arg2[%c0_2, %c0_3, %c0_4] : memref<9x1x128xf32, #tpu.memory_space<vmem>>, vector<9x1x128xf32>
    %c1_i32 = arith.constant 1 : i32
    %3 = tpu.dynamic_rotate %1 by %c1_i32 dim 1 : vector<18x128xf32>, i32 -> vector<18x128xf32>
    %4 = vector.extract_strided_slice %3 {offsets = [0, 0], sizes = [16, 128], strides = [1, 1]} : vector<18x128xf32> to vector<16x128xf32>
    %5 = vector.extract_strided_slice %2 {offsets = [0, 0, 0], sizes = [1, 1, 128], strides = [1, 1, 1]} : vector<9x1x128xf32> to vector<1x1x128xf32>
    %6 = vector.shape_cast %5 : vector<1x1x128xf32> to vector<1x128xf32>
    %7 = vector.broadcast %6 : vector<1x128xf32> to vector<16x128xf32>
    %8 = arith.mulf %4, %7 : vector<16x128xf32>
    %9 = vector.extract_strided_slice %3 {offsets = [1, 0], sizes = [16, 128], strides = [1, 1]} : vector<18x128xf32> to vector<16x128xf32>
    %10 = vector.extract_strided_slice %2 {offsets = [3, 0, 0], sizes = [1, 1, 128], strides = [1, 1, 1]} : vector<9x1x128xf32> to vector<1x1x128xf32>
    %11 = vector.shape_cast %10 : vector<1x1x128xf32> to vector<1x128xf32>
    %12 = vector.broadcast %11 : vector<1x128xf32> to vector<16x128xf32>
    %13 = arith.mulf %9, %12 : vector<16x128xf32>
    %14 = arith.addf %8, %13 : vector<16x128xf32>
    %15 = vector.extract_strided_slice %3 {offsets = [2, 0], sizes = [16, 128], strides = [1, 1]} : vector<18x128xf32> to vector<16x128xf32>
    %16 = vector.extract_strided_slice %2 {offsets = [6, 0, 0], sizes = [1, 1, 128], strides = [1, 1, 1]} : vector<9x1x128xf32> to vector<1x1x128xf32>
    %17 = vector.shape_cast %16 : vector<1x1x128xf32> to vector<1x128xf32>
    %18 = vector.broadcast %17 : vector<1x128xf32> to vector<16x128xf32>
    %19 = arith.mulf %15, %18 : vector<16x128xf32>
    %20 = arith.addf %14, %19 : vector<16x128xf32>
    %21 = vector.extract_strided_slice %1 {offsets = [0, 0], sizes = [16, 128], strides = [1, 1]} : vector<18x128xf32> to vector<16x128xf32>
    %22 = vector.extract_strided_slice %2 {offsets = [1, 0, 0], sizes = [1, 1, 128], strides = [1, 1, 1]} : vector<9x1x128xf32> to vector<1x1x128xf32>
    %23 = vector.shape_cast %22 : vector<1x1x128xf32> to vector<1x128xf32>
    %24 = vector.broadcast %23 : vector<1x128xf32> to vector<16x128xf32>
    %25 = arith.mulf %21, %24 : vector<16x128xf32>
    %26 = arith.addf %20, %25 : vector<16x128xf32>
    %27 = vector.extract_strided_slice %1 {offsets = [1, 0], sizes = [16, 128], strides = [1, 1]} : vector<18x128xf32> to vector<16x128xf32>
    %28 = vector.extract_strided_slice %2 {offsets = [4, 0, 0], sizes = [1, 1, 128], strides = [1, 1, 1]} : vector<9x1x128xf32> to vector<1x1x128xf32>
    %29 = vector.shape_cast %28 : vector<1x1x128xf32> to vector<1x128xf32>
    %30 = vector.broadcast %29 : vector<1x128xf32> to vector<16x128xf32>
    %31 = arith.mulf %27, %30 : vector<16x128xf32>
    %32 = arith.addf %26, %31 : vector<16x128xf32>
    %33 = vector.extract_strided_slice %1 {offsets = [2, 0], sizes = [16, 128], strides = [1, 1]} : vector<18x128xf32> to vector<16x128xf32>
    %34 = vector.extract_strided_slice %2 {offsets = [7, 0, 0], sizes = [1, 1, 128], strides = [1, 1, 1]} : vector<9x1x128xf32> to vector<1x1x128xf32>
    %35 = vector.shape_cast %34 : vector<1x1x128xf32> to vector<1x128xf32>
    %36 = vector.broadcast %35 : vector<1x128xf32> to vector<16x128xf32>
    %37 = arith.mulf %33, %36 : vector<16x128xf32>
    %38 = arith.addf %32, %37 : vector<16x128xf32>
    %c127_i32 = arith.constant 127 : i32
    %39 = tpu.dynamic_rotate %1 by %c127_i32 dim 1 : vector<18x128xf32>, i32 -> vector<18x128xf32>
    %40 = vector.extract_strided_slice %39 {offsets = [0, 0], sizes = [16, 128], strides = [1, 1]} : vector<18x128xf32> to vector<16x128xf32>
    %41 = vector.extract_strided_slice %2 {offsets = [2, 0, 0], sizes = [1, 1, 128], strides = [1, 1, 1]} : vector<9x1x128xf32> to vector<1x1x128xf32>
    %42 = vector.shape_cast %41 : vector<1x1x128xf32> to vector<1x128xf32>
    %43 = vector.broadcast %42 : vector<1x128xf32> to vector<16x128xf32>
    %44 = arith.mulf %40, %43 : vector<16x128xf32>
    %45 = arith.addf %38, %44 : vector<16x128xf32>
    %46 = vector.extract_strided_slice %39 {offsets = [1, 0], sizes = [16, 128], strides = [1, 1]} : vector<18x128xf32> to vector<16x128xf32>
    %47 = vector.extract_strided_slice %2 {offsets = [5, 0, 0], sizes = [1, 1, 128], strides = [1, 1, 1]} : vector<9x1x128xf32> to vector<1x1x128xf32>
    %48 = vector.shape_cast %47 : vector<1x1x128xf32> to vector<1x128xf32>
    %49 = vector.broadcast %48 : vector<1x128xf32> to vector<16x128xf32>
    %50 = arith.mulf %46, %49 : vector<16x128xf32>
    %51 = arith.addf %45, %50 : vector<16x128xf32>
    %52 = vector.extract_strided_slice %39 {offsets = [2, 0], sizes = [16, 128], strides = [1, 1]} : vector<18x128xf32> to vector<16x128xf32>
    %53 = vector.extract_strided_slice %2 {offsets = [8, 0, 0], sizes = [1, 1, 128], strides = [1, 1, 1]} : vector<9x1x128xf32> to vector<1x1x128xf32>
    %54 = vector.shape_cast %53 : vector<1x1x128xf32> to vector<1x128xf32>
    %55 = vector.broadcast %54 : vector<1x128xf32> to vector<16x128xf32>
    %56 = arith.mulf %52, %55 : vector<16x128xf32>
    %57 = arith.addf %51, %56 : vector<16x128xf32>
    %c0_5 = arith.constant 0 : index
    %c0_6 = arith.constant 0 : index
    %58 = vector.load %arg3[%c0_5, %c0_6] : memref<128x256xf32, #tpu.memory_space<vmem>>, vector<128x256xf32>
    %cst = arith.constant dense<0.000000e+00> : vector<16x256xf32>
    %59 = tpu.matmul %57, %58, %cst {dimension_numbers = #tpu.dot_dimension_numbers<[1], [0], [0], [1], [0, 0, 1, 1], [], []>, precision = #tpu.contract_precision<fp32>} : vector<16x128xf32>, vector<128x256xf32>, vector<16x256xf32> -> vector<16x256xf32>
    %c0_7 = arith.constant 0 : index
    %c0_8 = arith.constant 0 : index
    %60 = vector.load %arg4[%c0_7, %c0_8] : memref<1x256xf32, #tpu.memory_space<vmem>>, vector<1x256xf32>
    %61 = vector.broadcast %60 : vector<1x256xf32> to vector<16x256xf32>
    %62 = arith.addf %59, %61 : vector<16x256xf32>
    %cst_9 = arith.constant 0.000000e+00 : f32
    %63 = vector.broadcast %cst_9 : f32 to vector<16x256xf32>
    %64 = arith.maximumf %62, %63 : vector<16x256xf32>
    %c0_10 = arith.constant 0 : index
    %c0_11 = arith.constant 0 : index
    %c0_12 = arith.constant 0 : index
    %65 = vector.load %arg5[%c0_10, %c0_11, %c0_12] : memref<1x16x256xf32, #tpu.memory_space<vmem>>, vector<1x16x256xf32>
    %66 = vector.shape_cast %65 : vector<1x16x256xf32> to vector<16x256xf32>
    %67 = vector.shape_cast %64 : vector<16x256xf32> to vector<1x16x256xf32>
    tpu.vector_store %arg5[%c0_10, %c0_11, %c0_12], %67 {strides = array<i32>} : memref<1x16x256xf32, #tpu.memory_space<vmem>>, vector<1x16x256xf32>,
    return
  }
  func.func @transform_0(%arg0: i32) -> (i32, i32, i32) {
    %c0_i32 = arith.constant 0 : i32
    %c0_i32_0 = arith.constant 0 : i32
    %c0_i32_1 = arith.constant 0 : i32
    return %arg0, %c0_i32, %c0_i32_0 : i32, i32, i32
  }
  func.func @transform_1(%arg0: i32) -> (i32, i32, i32) {
    %c0_i32 = arith.constant 0 : i32
    %c0_i32_0 = arith.constant 0 : i32
    %c0_i32_1 = arith.constant 0 : i32
    %c0_i32_2 = arith.constant 0 : i32
    return %c0_i32, %c0_i32_0, %c0_i32_1 : i32, i32, i32
  }
  func.func @transform_2(%arg0: i32) -> (i32, i32) {
    %c0_i32 = arith.constant 0 : i32
    %c0_i32_0 = arith.constant 0 : i32
    %c0_i32_1 = arith.constant 0 : i32
    return %c0_i32, %c0_i32_0 : i32, i32
  }
  func.func @transform_3(%arg0: i32) -> (i32, i32) {
    %c0_i32 = arith.constant 0 : i32
    %c0_i32_0 = arith.constant 0 : i32
    %c0_i32_1 = arith.constant 0 : i32
    return %c0_i32, %c0_i32_0 : i32, i32
  }
  func.func @transform_4(%arg0: i32) -> (i32, i32, i32) {
    %c0_i32 = arith.constant 0 : i32
    %c0_i32_0 = arith.constant 0 : i32
    %c0_i32_1 = arith.constant 0 : i32
    return %arg0, %c0_i32, %c0_i32_0 : i32, i32, i32
  }
}

</mosaic_0001>

<bundles_post_ra>
// kernel: separable_conv2d.1
= control target key start
LH: loop header
LB: loop body
LE: loop exit
PB: predicated region body
PF: predicated region fallthrough
CT: control target
= control target key end

     0   :  { %s1385_s21 = smov 1   ;;  %s1386_s22 = smov 127   ;;  %vm55_vm0 = vcmask 1046528   ;;  %vm77_vm1 = vcmask 1045504   ;;  %s2048_s0 = inlined_call_operand.vmem [shape: f32[1,18,128], index: 0, kind: input, shape index: {}]   ;;  %s2049_s2 = inlined_call_operand.vmem [shape: f32[128,256], index: 2, kind: input, shape index: {}]   ;;  %s2050_s1 = inlined_call_operand.vmem [shape: f32[9,1,128], index: 1, kind: input, shape index: {}]   ;;  %s2051_s3 = inlined_call_operand.vmem [shape: f32[1,256], index: 3, kind: input, shape index: {}]   ;;  %s2052_s4 = inlined_call_operand.vmem [shape: f32[1,16,256], index: 4, kind: output, shape index: {}]  }
   0x1   :  { %v1416_v0 = vld [vmem:[%s2048_s0] sm:$0xff]  ;;  %v1421_v1 = vld [vmem:[%s2048_s0 + $0x8] sm:$0xff]  ;;  %v19_v2 = vld [vmem:[%s2048_s0 + $0x10] sm:$0x3] }
   0x2   :  { %29 = vrot.lane.b32.xlu0 %v1416_v0, %s1385_s21  ;;  %139 = vrot.lane.b32.xlu1 %v1416_v0, %s1386_s22  ;;  %v1161_v3 = vld [vmem:[%s2050_s1 + $0x4] ss:$0 sm:$0xff]  ;;  %v1162_v4 = vld [vmem:[%s2050_s1 + $0x7] ss:$0 sm:$0xff] }
   0x3   :  { %v1437_v5 = vmul.f32 %v1161_v3, %v1421_v1  ;;  %v1439_v6 = vmul.f32 %v1161_v3, %v19_v2  ;;  %v1442_v7 = vmul.f32 %v1162_v4, %v1421_v1  ;;  %v1444_v8 = vmul.f32 %v1162_v4, %v19_v2  ;;  %v198_v9 = vld [vmem:[%s2049_s2 + $0x8] sm:$0xff]  ;;  %v200_v10 = vld [vmem:[%s2049_s2 + $0x18] sm:$0xff]  ;;  %v197_v15 = vld [vmem:[%s2049_s2] sm:$0xff] }
   0x4   :  { %v1453_v11 = vmul.f32 %v1161_v3, %v1416_v0  ;;  %v1456_v12 = vmul.f32 %v1162_v4, %v1416_v0  ;;  %v241_v13 = vand.u32 4294901760, %v198_v9  ;;  %v245_v14 = vand.u32 4294901760, %v200_v10  ;;  %v199_v16 = vld [vmem:[%s2049_s2 + $0x10] sm:$0xff]  ;;  %v202_v17 = vld [vmem:[%s2049_s2 + $0x28] sm:$0xff]  ;;  %v204_v20 = vld [vmem:[%s2049_s2 + $0x38] sm:$0xff] }
   0x5   :  { %v110_v18 = vrot.slane %v1437_v5, 1  ;;  %v112_v19 = vrot.slane %v1439_v6, 1  ;;  %v201_v21 = vld [vmem:[%s2049_s2 + $0x20] sm:$0xff]  ;;  %v2053_v22 = vrot.slane %v1442_v7, 2  ;;  %v133_v23 = vrot.slane %v1444_v8, 2  ;;  %v203_v26 = vld [vmem:[%s2049_s2 + $0x30] sm:$0xff] }
   0x6   :  { %31 = vrot.lane.b32.xlu0 %v1421_v1, %s1385_s21  ;;  %v109_v24 = vrot.slane %v1453_v11, 1  ;;  %141 = vrot.lane.b32.xlu1 %v1421_v1, %s1386_s22  ;;  %v1482_v25 = vpack.c.bf16 %v245_v14, %v241_v13  ;;  %v206_v27 = vld [vmem:[%s2049_s2 + $0x48] sm:$0xff]  ;;  %v243_v29 = vand.u32 4294901760, %v197_v15  ;;  %v247_v30 = vand.u32 4294901760, %v199_v16  ;;  %v208_v32 = vld [vmem:[%s2049_s2 + $0x58] sm:$0xff] }
   0x7   :  { %v249_v31 = vand.u32 4294901760, %v202_v17  ;;  %v253_v33 = vand.u32 4294901760, %v204_v20  ;;  %v251_v34 = vand.u32 4294901760, %v201_v21  ;;  %v255_v35 = vand.u32 4294901760, %v203_v26  ;;  %v205_v37 = vld [vmem:[%s2049_s2 + $0x40] sm:$0xff]  ;;  %v207_v42 = vld [vmem:[%s2049_s2 + $0x50] sm:$0xff] }
   0x8   :  { %2084 = vst [vmem:[#allocation2_spill] sm:$0xff] %v1482_v25  ;;  %1263 = vmatprep.subr.bf16.mxu0 %v1482_v25  ;;  %1167 = vmatprep.subr.bf16.mxu1 %v1482_v25  ;;  %v257_v36 = vand.u32 4294901760, %v206_v27  ;;  %v1499_v38 = vpack.c.bf16 %v247_v30, %v243_v29  ;;  %v1501_v39 = vsub.f32 %v197_v15, %v243_v29  ;;  %v261_v46 = vand.u32 4294901760, %v208_v32  ;;  %v210_v47 = vld [vmem:[%s2049_s2 + $0x68] sm:$0xff]  ;;  %v212_v52 = vld [vmem:[%s2049_s2 + $0x78] sm:$0xff]  ;;  %v209_v53 = vld [vmem:[%s2049_s2 + $0x60] sm:$0xff] }
   0x9   :  { %v1503_v40 = vsub.f32 %v199_v16, %v247_v30  ;;  %v1505_v41 = vsub.f32 %v202_v17, %v249_v31  ;;  %v1512_v43 = vpack.c.bf16 %v253_v33, %v249_v31  ;;  %v1514_v44 = vsub.f32 %v204_v20, %v253_v33  ;;  %v211_v58 = vld [vmem:[%s2049_s2 + $0x70] sm:$0xff]  ;;  %v214_v63 = vld [vmem:[%s2049_s2 + $0x88] sm:$0xff]  ;;  %v213_v11 = vld [vmem:[%s2049_s2 + $0x80] sm:$0xff] }
   0xa   :  { %2085 = vst [vmem:[#allocation3_spill] sm:$0xff] %v1499_v38  ;;  %33 = vrot.lane.b32.xlu0 %v19_v2, %s1385_s21  ;;  %143 = vrot.lane.b32.xlu1 %v19_v2, %s1386_s22  ;;  %v1516_v45 = vpack.c.bf16 %v255_v35, %v251_v34  ;;  %v1523_v48 = vsub.f32 %v201_v21, %v251_v34  ;;  %v259_v51 = vand.u32 4294901760, %v205_v37  ;;  %v263_v57 = vand.u32 4294901760, %v207_v42  ;;  %v215_v17 = vld [vmem:[%s2049_s2 + $0x90] sm:$0xff]  ;;  %v218_v6 = vld [vmem:[%s2049_s2 + $0xa8] sm:$0xff] }
   0xb   :  { %2086 = vst [vmem:[#allocation4_spill] sm:$0xff] %v1512_v43  ;;  %1265 = vmatpush1.bf16.msra.mxu0 %v1499_v38  ;;  %1169 = vmatpush1.bf16.msra.mxu1 %v1499_v38  ;;  %v1525_v49 = vsub.f32 %v203_v26, %v255_v35  ;;  %v1527_v50 = vsub.f32 %v206_v27, %v257_v36  ;;  %v265_v62 = vand.u32 4294901760, %v210_v47  ;;  %v269_v4 = vand.u32 4294901760, %v212_v52  ;;  %v220_v5 = vld [vmem:[%s2049_s2 + $0xb8] sm:$0xff]  ;;  %v217_v21 = vld [vmem:[%s2049_s2 + $0xa0] sm:$0xff]  ;;  %v219_v29 = vld [vmem:[%s2049_s2 + $0xb0] sm:$0xff] }
   0xc   :  { %2087 = vst [vmem:[#allocation5_spill] sm:$0xff] %v1516_v45  ;;  %v1535_v54 = vsub.f32 %v198_v9, %v241_v13  ;;  %1267 = vmatprep.subr.bf16.mxu0 %v1512_v43  ;;  %1171 = vmatprep.subr.bf16.mxu1 %v1512_v43  ;;  %v1539_v55 = vpack.c.bf16 %v261_v46, %v257_v36  ;;  %v267_v9 = vand.u32 4294901760, %v209_v53  ;;  %v273_v20 = vand.u32 4294901760, %v214_v63  ;;  %v222_v34 = vld [vmem:[%s2049_s2 + $0xc8] sm:$0xff] }
   0xd   :  { %v1541_v56 = vsub.f32 %v208_v32, %v261_v46  ;;  %v1546_v59 = vsub.f32 %v200_v10, %v245_v14  ;;  %v1548_v60 = vsub.f32 %v205_v37, %v259_v51  ;;  %v1553_v61 = vsel %vm55_vm0, %v109_v24, %v110_v18  ;;  %v216_v10 = vld [vmem:[%s2049_s2 + $0x98] sm:$0xff] }
   0xe   :  { %2088 = vst [vmem:[#allocation6_spill] sm:$0xff] %v1539_v55  ;;  %v1558_v2 = vpack.c.bf16 %v263_v57, %v259_v51  ;;  %v1560_v3 = vsub.f32 %v207_v42, %v263_v57  ;;  %v1570_v13 = vsub.f32 %v210_v47, %v265_v62  ;;  %v271_v14 = vand.u32 4294901760, %v211_v58  ;;  %v224_v46 = vld [vmem:[%s2049_s2 + $0xd8] sm:$0xff]  ;;  %v221_v47 = vld [vmem:[%s2049_s2 + $0xc0] sm:$0xff] }
   0xf   :  { %1269 = vmatpush1.bf16.msra.mxu0 %v1516_v45  ;;  %1173 = vmatpush1.bf16.msra.mxu1 %v1516_v45  ;;  %v1577_v15 = vsel %vm55_vm0, %v110_v18, %v112_v19  ;;  %v1584_v16 = vsel %vm77_vm1, %v2053_v22, %v133_v23  ;;  %v1597_v8 = vpack.c.bf16 %v269_v4, %v265_v62  ;;  %v277_v26 = vand.u32 4294901760, %v216_v10  ;;  %v226_v62 = vld [vmem:[%s2049_s2 + $0xe8] sm:$0xff] }
  0x10   :  { %2089 = vst [vmem:[#allocation7_spill] sm:$0xff] %v1558_v2  ;;  %1271 = vmatprep.subr.bf16.mxu0 %v1539_v55  ;;  %1175 = vmatprep.subr.bf16.mxu1 %v1539_v55  ;;  %v1599_v18 = vsub.f32 %v212_v52, %v269_v4  ;;  %v1601_v19 = vsub.f32 %v209_v53, %v267_v9  ;;  %v275_v27 = vand.u32 4294901760, %v213_v11  ;;  %v279_v31 = vand.u32 4294901760, %v215_v17 }
  0x11   :  { %2090 = vst [vmem:[#allocation8_spill] sm:$0xff] %v1597_v8  ;;  %v1606_v23 = vpack.c.bf16 %v271_v14, %v267_v9  ;;  %v1608_v24 = vsub.f32 %v211_v58, %v271_v14  ;;  %v1613_v30 = vsub.f32 %v214_v63, %v273_v20  ;;  %v281_v32 = vand.u32 4294901760, %v218_v6  ;;  %v223_v58 = vld [vmem:[%s2049_s2 + $0xd0] sm:$0xff]  ;;  %v228_v63 = vld [vmem:[%s2049_s2 + $0xf8] sm:$0xff]  ;;  %v225_v14 = vld [vmem:[%s2049_s2 + $0xe0] sm:$0xff] }
  0x12   :  { %v285_v33 = vand.u32 4294901760, %v220_v5  ;;  %v1620_v35 = vpack.c.bf16 %v277_v26, %v273_v20  ;;  %v1622_v36 = vsub.f32 %v216_v10, %v277_v26  ;;  %v1624_v37 = vsub.f32 %v213_v11, %v275_v27 }
  0x13   :  { %2091 = vst [vmem:[#allocation9_spill] sm:$0xff] %v1606_v23  ;;  %1273 = vmatpush1.bf16.msra.mxu0 %v1558_v2  ;;  %1177 = vmatpush1.bf16.msra.mxu1 %v1558_v2  ;;  %v283_v42 = vand.u32 4294901760, %v217_v21  ;;  %v1634_v51 = vpack.c.bf16 %v279_v31, %v275_v27  ;;  %v1636_v52 = vsub.f32 %v215_v17, %v279_v31  ;;  %v287_v57 = vand.u32 4294901760, %v219_v29 }
  0x14   :  { %2092 = vst [vmem:[#allocation10_spill] sm:$0xff] %v1620_v35  ;;  %1275 = vmatprep.subr.bf16.mxu0 %v1597_v8  ;;  %1179 = vmatprep.subr.bf16.mxu1 %v1597_v8  ;;  %v1638_v53 = vpack.c.bf16 %v285_v33, %v281_v32  ;;  %v1649_v4 = vsub.f32 %v218_v6, %v281_v32  ;;  %v289_v11 = vand.u32 4294901760, %v222_v34  ;;  %v293_v26 = vand.u32 4294901760, %v224_v46  ;;  %v227_v32 = vld [vmem:[%s2049_s2 + $0xf0] sm:$0xff] }
  0x15   :  { %2093 = vst [vmem:[#allocation11_spill] sm:$0xff] %v1634_v51  ;;  %v1651_v9 = vsub.f32 %v220_v5, %v285_v33  ;;  %v1653_v10 = vsub.f32 %v217_v21, %v283_v42  ;;  %v1658_v17 = vpack.c.bf16 %v287_v57, %v283_v42  ;;  %v1660_v20 = vsub.f32 %v219_v29, %v287_v57 }
  0x16   :  { %2094 = vst [vmem:[#allocation12_spill] sm:$0xff] %v1638_v53  ;;  %2095 = vst [vmem:[#allocation13_spill] sm:$0xff] %v1649_v4  ;;  %v291_v27 = vand.u32 4294901760, %v221_v47  ;;  %v1664_v6 = vsub.f32 %v222_v34, %v289_v11  ;;  %v295_v5 = vand.u32 4294901760, %v223_v58  ;;  %v297_v21 = vand.u32 4294901760, %v226_v62 }
  0x17   :  { %2096 = vst [vmem:[#allocation14_spill] sm:$0xff] %v1651_v9  ;;  %2097 = vst [vmem:[#allocation15_spill] sm:$0xff] %v1653_v10  ;;  %1277 = vmatpush1.bf16.msra.mxu0 %v1606_v23  ;;  %1181 = vmatpush1.bf16.msra.mxu1 %v1606_v23  ;;  %v301_v31 = vand.u32 4294901760, %v228_v63  ;;  %v1671_v29 = vpack.c.bf16 %v293_v26, %v289_v11  ;;  %v1673_v33 = vsub.f32 %v224_v46, %v293_v26 }
  0x18   :  { %2098 = vst [vmem:[#allocation16_spill] sm:$0xff] %v1658_v17  ;;  %2099 = vst [vmem:[#allocation17_spill] sm:$0xff] %v1660_v20  ;;  %1279 = vmatprep.subr.bf16.mxu0 %v1620_v35  ;;  %1183 = vmatprep.subr.bf16.mxu1 %v1620_v35  ;;  %v1675_v42 = vsub.f32 %v221_v47, %v291_v27  ;;  %v299_v57 = vand.u32 4294901760, %v225_v14  ;;  %v1677_v34 = vpack.c.bf16 %v295_v5, %v291_v27 }
  0x19   :  { %2100 = vst [vmem:[#allocation18_spill] sm:$0xff] %v1664_v6  ;;  %2101 = vst [vmem:[#allocation19_spill] sm:$0xff] %v1671_v29  ;;  %v1679_v28 = vsub.f32 %v223_v58, %v295_v5  ;;  %v1681_v22 = vpack.c.bf16 %v301_v31, %v297_v21  ;;  %v1683_v23 = vsub.f32 %v226_v62, %v297_v21  ;;  %v303_v2 = vand.u32 4294901760, %v227_v32 }
  0x1a   :  { %2102 = vst [vmem:[#allocation20_spill] sm:$0xff] %v1673_v33  ;;  %2103 = vst [vmem:[#allocation21_spill] sm:$0xff] %v1675_v42  ;;  %v1685_v8 = vsub.f32 %v228_v63, %v301_v31  ;;  %v1687_v55 = vsub.f32 %v225_v14, %v299_v57  ;;  %v362_v46 = vand.u32 4294901760, %v1535_v54  ;;  %v374_v47 = vand.u32 4294901760, %v1546_v59 }
  0x1b   :  { %2104 = vst [vmem:[#allocation22_spill] sm:$0xff] %v1677_v34  ;;  %2105 = vst [vmem:[#allocation23_spill] sm:$0xff] %v1679_v28  ;;  %1281 = vmatpush1.bf16.msra.mxu0 %v1634_v51  ;;  %1185 = vmatpush1.bf16.msra.mxu1 %v1634_v51  ;;  %v2110_v58 = vrot.slane %v1442_v7, 2  ;;  %v2111_v11 = vrot.slane %v1456_v12, 2  ;;  %v368_v63 = vand.u32 4294901760, %v1501_v39  ;;  %v1703_v14 = vpack.c.bf16 %v303_v2, %v299_v57 }
  0x1c   :  { %2106 = vst [vmem:[#allocation24_spill] sm:$0xff] %v1681_v22  ;;  %2107 = vst [vmem:[#allocation25_spill] sm:$0xff] %v1683_v23  ;;  %1283 = vmatprep.subr.bf16.mxu0 %v1638_v53  ;;  %1187 = vmatprep.subr.bf16.mxu1 %v1638_v53  ;;  %v1705_v26 = vsub.f32 %v227_v32, %v303_v2  ;;  %v380_v27 = vand.u32 4294901760, %v1503_v40  ;;  %v386_v5 = vand.u32 4294901760, %v1505_v41  ;;  %v2059_v7 = vmov 0.0  }
  0x1d   :  { %2108 = vst [vmem:[#allocation26_spill] sm:$0xff] %v1685_v8  ;;  %2109 = vst [vmem:[#allocation27_spill] sm:$0xff] %v1687_v55  ;;  %v1698_v62 = vsel %vm77_vm1, %v2111_v11, %v2110_v58  ;;  %840 = vmatprep.mubr.f32.mxu0 %v2059_v7  ;;  %v1294_v12 = vpack.c.bf16 %v374_v47, %v362_v46  ;;  %337 = vmatprep.mubr.f32.mxu1 %v2059_v7  ;;  %v398_v58 = vand.u32 4294901760, %v1514_v44 }
  0x1e   :  { %2112 = vst [vmem:[#allocation28_spill] sm:$0xff] %v1703_v14  ;;  %2113 = vst [vmem:[#allocation29_spill] sm:$0xff] %v1705_v26  ;;  %v363_v21 = vsub.f32 %v1535_v54, %v362_v46  ;;  %v375_v31 = vsub.f32 %v1546_v59, %v374_v47  ;;  %v1714_v57 = vpack.c.bf16 %v380_v27, %v368_v63  ;;  %v392_v11 = vand.u32 4294901760, %v1523_v48 }
  0x1f   :  { %v369_v2 = vsub.f32 %v1501_v39, %v368_v63  ;;  %v381_v32 = vsub.f32 %v1503_v40, %v380_v27  ;;  %1285 = vmatpush1.bf16.msra.mxu0 %v1658_v17  ;;  %1189 = vmatpush1.bf16.msra.mxu1 %v1658_v17  ;;  %v1721_v51 = vpack.c.bf16 %v398_v58, %v386_v5  ;;  %v404_v46 = vand.u32 4294901760, %v1525_v49 }
  0x20   :  { %v364_v53 = vand.u32 4294901760, %v363_v21  ;;  %v376_v7 = vand.u32 4294901760, %v375_v31  ;;  %1287 = vmatprep.subr.bf16.mxu0 %v1671_v29  ;;  %1191 = vmatprep.subr.bf16.mxu1 %v1671_v29  ;;  %v387_v27 = vsub.f32 %v1505_v41, %v386_v5  ;;  %v399_v35 = vsub.f32 %v1514_v44, %v398_v58 }
  0x21   :  { %2114 = vst [vmem:[#allocation30_spill] sm:$0xff] %v1721_v51  ;;  %v370_v47 = vand.u32 4294901760, %v369_v2  ;;  %v382_v63 = vand.u32 4294901760, %v381_v32  ;;  %v1728_v43 = vpack.c.bf16 %v404_v46, %v392_v11  ;;  %v410_v21 = vand.u32 4294901760, %v1527_v50 }
  0x22   :  { %v1198_v45 = vpack.c.bf16 %v376_v7, %v364_v53  ;;  %v422_v31 = vand.u32 4294901760, %v1541_v56  ;;  %v388_v38 = vand.u32 4294901760, %v387_v27  ;;  %v400_v25 = vand.u32 4294901760, %v399_v35 }
  0x23   :  { %v1732_v17 = vpack.c.bf16 %v382_v63, %v370_v47  ;;  %v393_v51 = vsub.f32 %v1523_v48, %v392_v11  ;;  %1289 = vmatpush1.bf16.msra.mxu0 %v1677_v34  ;;  %1193 = vmatpush1.bf16.msra.mxu1 %v1677_v34  ;;  %v405_v53 = vsub.f32 %v1525_v49, %v404_v46  ;;  %v416_v7 = vand.u32 4294901760, %v1548_v60 }
  0x24   :  { %v1737_v5 = vpack.c.bf16 %v422_v31, %v410_v21  ;;  %v428_v58 = vand.u32 4294901760, %v1560_v3  ;;  %1291 = vmatprep.subr.bf16.mxu0 %v1681_v22  ;;  %1195 = vmatprep.subr.bf16.mxu1 %v1681_v22  ;;  %v1744_v2 = vpack.c.bf16 %v400_v25, %v388_v38  ;;  %v411_v32 = vsub.f32 %v1527_v50, %v410_v21 }
  0x25   :  { %v394_v35 = vand.u32 4294901760, %v393_v51  ;;  %v423_v11 = vsub.f32 %v1541_v56, %v422_v31  ;;  %v406_v47 = vand.u32 4294901760, %v405_v53  ;;  %v434_v46 = vand.u32 4294901760, %v1570_v13 }
  0x26   :  { %2115 = vst [vmem:[#allocation31_spill] sm:$0xff] %v1737_v5  ;;  %v1748_v63 = vpack.c.bf16 %v428_v58, %v416_v7  ;;  %v446_v27 = vand.u32 4294901760, %v1599_v18  ;;  %v412_v34 = vand.u32 4294901760, %v411_v32  ;;  %v417_v5 = vsub.f32 %v1548_v60, %v416_v7 }
  0x27   :  { %v424_v29 = vand.u32 4294901760, %v423_v11  ;;  %v429_v22 = vsub.f32 %v1560_v3, %v428_v58  ;;  %1293 = vmatpush1.bf16.msra.mxu0 %v1703_v14  ;;  %1197 = vmatpush1.bf16.msra.mxu1 %v1703_v14  ;;  %v1756_v25 = vpack.c.bf16 %v406_v47, %v394_v35  ;;  %v440_v51 = vand.u32 4294901760, %v1601_v19 }
  0x28   :  { %v1758_v38 = vpack.c.bf16 %v446_v27, %v434_v46  ;;  %v452_v21 = vand.u32 4294901760, %v1608_v24  ;;  %1295 = vmatprep.subr.bf16.mxu0 %v1294_v12  ;;  %1199 = vmatprep.subr.bf16.mxu1 %v1198_v45  ;;  %v418_v53 = vand.u32 4294901760, %v417_v5  ;;  %v435_v58 = vsub.f32 %v1570_v13, %v434_v46 }
  0x29   :  { %v1762_v31 = vpack.c.bf16 %v424_v29, %v412_v34  ;;  %v430_v7 = vand.u32 4294901760, %v429_v22  ;;  %v447_v11 = vsub.f32 %v1599_v18, %v446_v27  ;;  %v458_v35 = vand.u32 4294901760, %v1613_v30 }
  0x2a   :  { %2116 = vst [vmem:[#allocation32_spill] sm:$0xff] %v1758_v38  ;;  %v1765_v32 = vpack.c.bf16 %v452_v21, %v440_v51  ;;  %v470_v47 = vand.u32 4294901760, %v1622_v36  ;;  %v436_v38 = vand.u32 4294901760, %v435_v58  ;;  %v441_v12 = vsub.f32 %v1601_v19, %v440_v51 }
  0x2b   :  { %2117 = vst [vmem:[#allocation33_spill] sm:$0xff] %v1762_v31  ;;  %v1770_v14 = vpack.c.bf16 %v430_v7, %v418_v53  ;;  %v453_v45 = vsub.f32 %v1608_v24, %v452_v21  ;;  %v448_v29 = vand.u32 4294901760, %v447_v11  ;;  %v464_v22 = vand.u32 4294901760, %v1624_v37 }
  0x2c   :  { %2118 = vst [vmem:[#allocation34_spill] sm:$0xff] %v1765_v32  ;;  %v1774_v34 = vpack.c.bf16 %v470_v47, %v458_v35  ;;  %v476_v5 = vand.u32 4294901760, %v1636_v52  ;;  %v442_v46 = vand.u32 4294901760, %v441_v12  ;;  %v459_v32 = vsub.f32 %v1613_v30, %v458_v35 }
  0x2d   :  { %2119 = vst [vmem:[#allocation35_spill] sm:$0xff] %v1770_v14  ;;  %v454_v27 = vand.u32 4294901760, %v453_v45  ;;  %v471_v31 = vsub.f32 %v1622_v36, %v470_v47  ;;  %v1780_v53 = vpack.c.bf16 %v448_v29, %v436_v38  ;;  %v482_v51 = vand.u32 4294901760, %v1649_v4 }
  0x2e   :  { %2120 = vst [vmem:[#allocation36_spill] sm:$0xff] %v1774_v34  ;;  %v1782_v7 = vpack.c.bf16 %v476_v5, %v464_v22  ;;  %v494_v21 = vand.u32 4294901760, %v1651_v9  ;;  %v460_v11 = vand.u32 4294901760, %v459_v32  ;;  %v465_v14 = vsub.f32 %v1624_v37, %v464_v22 }
  0x2f   :  { %2121 = vst [vmem:[#allocation37_spill] sm:$0xff] %v1780_v53  ;;  %v1786_v58 = vpack.c.bf16 %v454_v27, %v442_v46  ;;  %v472_v34 = vand.u32 4294901760, %v471_v31  ;;  %v477_v35 = vsub.f32 %v1636_v52, %v476_v5  ;;  %v488_v47 = vand.u32 4294901760, %v1653_v10 }
  0x30   :  { %2122 = vst [vmem:[#allocation38_spill] sm:$0xff] %v1782_v7  ;;  %v1789_v12 = vpack.c.bf16 %v494_v21, %v482_v51  ;;  %v500_v38 = vand.u32 4294901760, %v1660_v20  ;;  %v466_v29 = vand.u32 4294901760, %v465_v14  ;;  %v483_v7 = vsub.f32 %v1649_v4, %v482_v51 }
  0x31   :  { %2123 = vst [vmem:[#allocation39_spill] sm:$0xff] %v1786_v58  ;;  %v1794_v45 = vpack.c.bf16 %v472_v34, %v460_v11  ;;  %v495_v46 = vsub.f32 %v1651_v9, %v494_v21  ;;  %v478_v27 = vand.u32 4294901760, %v477_v35  ;;  %v506_v31 = vand.u32 4294901760, %v1664_v6 }
  0x32   :  { %2124 = vst [vmem:[#allocation40_spill] sm:$0xff] %v1789_v12  ;;  %v1798_v32 = vpack.c.bf16 %v500_v38, %v488_v47  ;;  %v518_v22 = vand.u32 4294901760, %v1673_v33  ;;  %v484_v12 = vand.u32 4294901760, %v483_v7  ;;  %v489_v58 = vsub.f32 %v1653_v10, %v488_v47  ;;  %v1164_v10 = vld [vmem:[%s2050_s1 + $0x5] ss:$0 sm:$0xff] }
  0x33   :  { %2125 = vst [vmem:[#allocation41_spill] sm:$0xff] %v1794_v45  ;;  %v496_v5 = vand.u32 4294901760, %v495_v46  ;;  %v501_v53 = vsub.f32 %v1660_v20, %v500_v38  ;;  %v1804_v34 = vpack.c.bf16 %v478_v27, %v466_v29  ;;  %v512_v51 = vand.u32 4294901760, %v1675_v42 }
  0x34   :  { %2126 = vst [vmem:[#allocation42_spill] sm:$0xff] %v1798_v32  ;;  %v1806_v14 = vpack.c.bf16 %v518_v22, %v506_v31  ;;  %v524_v21 = vand.u32 4294901760, %v1679_v28  ;;  %v490_v35 = vand.u32 4294901760, %v489_v58  ;;  %v507_v45 = vsub.f32 %v1664_v6, %v506_v31 }
  0x35   :  { %2127 = vst [vmem:[#allocation43_spill] sm:$0xff] %v1804_v34  ;;  %v1810_v11 = vpack.c.bf16 %v496_v5, %v484_v12  ;;  %v502_v32 = vand.u32 4294901760, %v501_v53  ;;  %v519_v47 = vsub.f32 %v1673_v33, %v518_v22  ;;  %v530_v38 = vand.u32 4294901760, %v1683_v23 }
  0x36   :  { %2128 = vst [vmem:[#allocation44_spill] sm:$0xff] %v1806_v14  ;;  %v1813_v7 = vpack.c.bf16 %v524_v21, %v512_v51  ;;  %v542_v29 = vand.u32 4294901760, %v1685_v8  ;;  %v508_v27 = vand.u32 4294901760, %v507_v45  ;;  %v513_v14 = vsub.f32 %v1675_v42, %v512_v51 }
  0x37   :  { %2129 = vst [vmem:[#allocation45_spill] sm:$0xff] %v1810_v11  ;;  %v1818_v46 = vpack.c.bf16 %v502_v32, %v490_v35  ;;  %v525_v12 = vsub.f32 %v1679_v28, %v524_v21  ;;  %v520_v5 = vand.u32 4294901760, %v519_v47  ;;  %v536_v53 = vand.u32 4294901760, %v1687_v55 }
  0x38   :  { %2130 = vst [vmem:[#allocation46_spill] sm:$0xff] %v1813_v7  ;;  %v1822_v58 = vpack.c.bf16 %v542_v29, %v530_v38  ;;  %v548_v31 = vand.u32 4294901760, %v1705_v26  ;;  %v514_v7 = vand.u32 4294901760, %v513_v14  ;;  %v531_v11 = vsub.f32 %v1683_v23, %v530_v38 }
  0x39   :  { %2131 = vst [vmem:[#allocation47_spill] sm:$0xff] %v1818_v46  ;;  %v526_v22 = vand.u32 4294901760, %v525_v12  ;;  %v543_v34 = vsub.f32 %v1685_v8, %v542_v29  ;;  %v1828_v32 = vpack.c.bf16 %v520_v5, %v508_v27  ;;  %v537_v51 = vsub.f32 %v1687_v55, %v536_v53 }
  0x3a   :  { %2132 = vst [vmem:[#allocation48_spill] sm:$0xff] %v1822_v58  ;;  %v1830_v45 = vpack.c.bf16 %v548_v31, %v536_v53  ;;  %v549_v21 = vsub.f32 %v1705_v26, %v548_v31  ;;  %v532_v47 = vand.u32 4294901760, %v531_v11 }
  0x3b   :  { %v1834_v35 = vpack.c.bf16 %v526_v22, %v514_v7  ;;  %v544_v58 = vand.u32 4294901760, %v543_v34  ;;  %v538_v12 = vand.u32 4294901760, %v537_v51  ;;  %v1159_v51 = vld [vmem:[%s2050_s1 + $0x6] ss:$0 sm:$0xff] }
  0x3c   :  { %v550_v46 = vand.u32 4294901760, %v549_v21 }
  0x3d   :  { %v1842_v27 = vpack.c.bf16 %v544_v58, %v532_v47  ;;  %v1157_v47 = vld [vmem:[%s2050_s1] ss:$0 sm:$0xff]  ;;  %v1160_v58 = vld [vmem:[%s2050_s1 + $0x1] ss:$0 sm:$0xff] }
  0x3e   :  { %v1846_v7 = vpack.c.bf16 %v550_v46, %v538_v12  ;;  %v1158_v46 = vld [vmem:[%s2050_s1 + $0x3] ss:$0 sm:$0xff]  ;;  %v93_v33 = vmul.f32 %v1160_v58, %v1416_v0  ;;  %v94_v0 = vmul.f32 %v1160_v58, %v1421_v1 }
  0x74   :  { %v30_v31 = vpop.permute.xlu0 %29  ;;  %v140_v22 = vpop.permute.xlu1 %139 }
  0x75   :  { %v49_v21 = vmul.f32 %v1158_v46, %v30_v31  ;;  %v71_v11 = vmul.f32 %v1159_v51, %v30_v31  ;;  %v41_v14 = vmul.f32 %v1157_v47, %v30_v31 }
  0x77   :  { %v56_v5 = vrot.slane %v49_v21, 1  ;;  %v78_v8 = vrot.slane %v71_v11, 2 }
  0x78   :  { %v32_v53 = vpop.permute.xlu0 %31  ;;  %v142_v26 = vpop.permute.xlu1 %141 }
  0x79   :  { %v50_v12 = vmul.f32 %v1158_v46, %v32_v53  ;;  %v72_v34 = vmul.f32 %v1159_v51, %v32_v53 }
  0x7b   :  { %v57_v29 = vrot.slane %v50_v12, 1  ;;  %v79_v38 = vrot.slane %v72_v34, 2  ;;  %v42_v34 = vmul.f32 %v1157_v47, %v32_v53 }
  0x7c   :  { %v34_v55 = vpop.permute.xlu0 %33 }
  0x7d   :  { %v58_v23 = vsel %vm55_vm0, %v56_v5, %v57_v29  ;;  %v51_v42 = vmul.f32 %v1158_v46, %v34_v55  ;;  %v73_v28 = vmul.f32 %v1159_v51, %v34_v55  ;;  %v80_v20 = vsel %vm77_vm1, %v78_v8, %v79_v38  ;;  %v1165_v5 = vld [vmem:[%s2050_s1 + $0x8] ss:$0 sm:$0xff]  ;;  %v144_v51 = vpop.permute.xlu1 %143  ;;  %v1163_v8 = vld [vmem:[%s2050_s1 + $0x2] ss:$0 sm:$0xff] }
  0x7e   :  { %v63_v6 = vadd.f32 %v58_v23, %v41_v14  ;;  %v161_v55 = vmul.f32 %v1164_v10, %v140_v22  ;;  %v162_v23 = vmul.f32 %v1164_v10, %v142_v26  ;;  %v151_v4 = vmul.f32 %v1163_v8, %v140_v22 }
  0x7f   :  { %v59_v21 = vrot.slane %v51_v42, 1  ;;  %v81_v12 = vrot.slane %v73_v28, 2 }
  0x80   :  { %v85_v31 = vadd.f32 %v80_v20, %v63_v6  ;;  %v182_v20 = vmul.f32 %v1165_v5, %v140_v22  ;;  %v183_v6 = vmul.f32 %v1165_v5, %v142_v26  ;;  %v167_v47 = vrot.slane %v161_v55, 1 }
  0x81   :  { %v60_v11 = vsel %vm55_vm0, %v57_v29, %v59_v21  ;;  %v82_v28 = vsel %vm77_vm1, %v79_v38, %v81_v12  ;;  %v168_v29 = vrot.slane %v162_v23, 1  ;;  %v163_v21 = vmul.f32 %v1164_v10, %v144_v51 }
  0x82   :  { %v64_v14 = vadd.f32 %v60_v11, %v42_v34  ;;  %v95_v46 = vadd.f32 %v93_v33, %v85_v31  ;;  %v188_v33 = vrot.slane %v182_v20, 2  ;;  %v189_v58 = vrot.slane %v183_v6, 2  ;;  %v2134_v20 = vld [vmem:[#allocation30_spill] sm:$0xff] }
  0x83   :  { %v184_v34 = vmul.f32 %v1165_v5, %v144_v51  ;;  %v169_v38 = vsel %vm55_vm0, %v167_v47, %v168_v29  ;;  %v170_v12 = vrot.slane %v163_v21, 1  ;;  %v2135_v47 = vld [vmem:[#allocation31_spill] sm:$0xff]  ;;  %v2137_v21 = vld [vmem:[#allocation32_spill] sm:$0xff] }
  0x84   :  { %v86_v42 = vadd.f32 %v82_v28, %v64_v14  ;;  %v116_v53 = vadd.f32 %v1553_v61, %v95_v46  ;;  %v152_v28 = vmul.f32 %v1163_v8, %v142_v26  ;;  %v190_v55 = vsel %vm77_vm1, %v188_v33, %v189_v58  ;;  %v2142_v33 = vld [vmem:[#allocation39_spill] sm:$0xff] }
  0x85   :  { %v191_v10 = vrot.slane %v184_v34, 2  ;;  %v2133_v8 = vmov 0.0   ;;  %v2146_v34 = vld [vmem:[#allocation43_spill] sm:$0xff] }
  0x86   :  { %v96_v9 = vadd.f32 %v94_v0, %v86_v42  ;;  %v137_v1 = vadd.f32 %v1698_v62, %v116_v53  ;;  %v171_v62 = vsel %vm55_vm0, %v168_v29, %v170_v12  ;;  %v2136_v29 = vld [vmem:[#allocation33_spill] sm:$0xff]  ;;  %v2150_v12 = vld [vmem:[#allocation47_spill] sm:$0xff] }
  0x88   :  { %v117_v31 = vadd.f32 %v1577_v15, %v96_v9  ;;  %v153_v11 = vadd.f32 %v151_v4, %v137_v1  ;;  %v192_v15 = vsel %vm77_vm1, %v189_v58, %v191_v10  ;;  %v2141_v1 = vld [vmem:[#allocation36_spill] sm:$0xff]  ;;  %v2143_v58 = vld [vmem:[#allocation38_spill] sm:$0xff] }
  0x89   :  { %v2156_v10 = vld [vmem:[#allocation4_spill] sm:$0xff] }
  0x8a   :  { %v138_v14 = vadd.f32 %v1584_v16, %v117_v31  ;;  %v174_v61 = vadd.f32 %v169_v38, %v153_v11  ;;  %v2147_v31 = vld [vmem:[#allocation42_spill] sm:$0xff]  ;;  %v2148_v11 = vld [vmem:[#allocation45_spill] sm:$0xff]  ;;  %v2149_v38 = vld [vmem:[#allocation44_spill] sm:$0xff] }
  0x8c   :  { %v154_v22 = vadd.f32 %v152_v28, %v138_v14  ;;  %v195_v23 = vadd.f32 %v190_v55, %v174_v61  ;;  %v2151_v14 = vld [vmem:[#allocation46_spill] sm:$0xff]  ;;  %v2152_v28 = vld [vmem:[#allocation48_spill] sm:$0xff]  ;;  %v2154_v55 = vld [vmem:[#allocation3_spill] sm:$0xff] }
  0x8d   :  { %v2153_v61 = vld [vmem:[#allocation2_spill] sm:$0xff] }
  0x8e   :  { %v175_v0 = vadd.f32 %v171_v62, %v154_v22  ;;  %v1906_v46 = vand.u32 4294901760, %v195_v23  ;;  %v2171_v22 = vpack.c.bf16 %v1622_v36, %v1613_v30  ;;  %v2182_v30 = vld [vmem:[#allocation22_spill] sm:$0xff]  ;;  %v2183_v36 = vld [vmem:[#allocation20_spill] sm:$0xff] }
  0x90   :  { %v196_v4 = vadd.f32 %v192_v15, %v175_v0  ;;  %v1910_v9 = vsub.f32 %v195_v23, %v1906_v46  ;;  %v2176_v23 = vld [vmem:[#allocation13_spill] sm:$0xff]  ;;  %v2180_v0 = vld [vmem:[#allocation15_spill] sm:$0xff] }
  0x92   :  { %v1912_v5 = vand.u32 4294901760, %v196_v4  ;;  %v340_v16 = vand.u32 4294901760, %v1910_v9 }
  0x94   :  { %844 = vmatmul.mubr.f32.vlgmr.msra.gmra.mrb[0].mxu0 %v340_v16  ;;  %v341_v26 = vsub.f32 %v1910_v9, %v340_v16  ;;  %v1917_v51 = vsub.f32 %v196_v4, %v1912_v5  ;;  %v2184_v4 = vld [vmem:[#allocation18_spill] sm:$0xff] }
  0x95   :  { %1297 = vmatpush1.bf16.msra.mxu0 %v1714_v57  ;;  %849 = vmatprep.mubr.f32.mxu0 %v2133_v8  ;;  %v2185_v16 = vpack.c.bf16 %v2183_v36, %v2184_v4 }
  0x96   :  { %1299 = vmatprep.subr.bf16.mxu0 %v2134_v20  ;;  %v342_v6 = vand.u32 4294901760, %v341_v26  ;;  %v351_v42 = vand.u32 4294901760, %v1917_v51  ;;  %v2188_v26 = vld [vmem:[#allocation21_spill] sm:$0xff] }
  0x98   :  { %343 = vmatmul.mubr.f32.vlgmr.msra.gmra.mrb[0].mxu1 %v342_v6  ;;  %853 = vmatmul.mubr.f32.gmra.mrb[2].mxu0 %v351_v42  ;;  %v352_v53 = vsub.f32 %v1917_v51, %v351_v42  ;;  %v2190_v6 = vld [vmem:[#allocation28_spill] sm:$0xff]  ;;  %v2191_v42 = vld [vmem:[#allocation26_spill] sm:$0xff] }
  0x99   :  { %1201 = vmatpush1.bf16.msra.mxu1 %v1732_v17  ;;  %1301 = vmatpush1.bf16.msra.mxu0 %v1728_v43  ;;  %v2138_v43 = vld [vmem:[#allocation35_spill] sm:$0xff]  ;;  %v2139_v17 = vld [vmem:[#allocation34_spill] sm:$0xff] }
  0x9a   :  { %348 = vmatprep.mubr.f32.mxu1 %v2133_v8  ;;  %1203 = vmatprep.subr.bf16.mxu1 %v1744_v2  ;;  %v353_v57 = vand.u32 4294901760, %v352_v53  ;;  %v2140_v2 = vld [vmem:[#allocation37_spill] sm:$0xff] }
  0x9b   :  { %1303 = vmatprep.subr.bf16.mxu0 %v2135_v47  ;;  %1019 = vmatprep.mubr.f32.mxu0 %v2133_v8  ;;  %v2192_v53 = vld [vmem:[#allocation25_spill] sm:$0xff] }
  0x9c   :  { %354 = vmatmul.mubr.f32.gmra.mrb[2].mxu1 %v353_v57  ;;  %v2193_v57 = vpack.c.bf16 %v2191_v42, %v2192_v53  ;;  %v2194_v47 = vld [vmem:[#allocation29_spill] sm:$0xff] }
  0x9d   :  { %1205 = vmatpush1.bf16.msra.mxu1 %v1756_v25  ;;  %1305 = vmatpush1.bf16.msra.mxu0 %v1748_v63  ;;  %v2144_v25 = vld [vmem:[#allocation41_spill] sm:$0xff]  ;;  %v2145_v63 = vld [vmem:[#allocation40_spill] sm:$0xff] }
  0x9e   :  { %1207 = vmatprep.subr.bf16.mxu1 %v2136_v29  ;;  %1307 = vmatprep.subr.bf16.mxu0 %v2137_v21  ;;  %v2195_v29 = vld [vmem:[#allocation27_spill] sm:$0xff] }
  0x9f   :  { %584 = vmatprep.mubr.f32.mxu1 %v2133_v8  ;;  %v2196_v21 = vpack.c.bf16 %v2194_v47, %v2195_v29 }
  0xa1   :  { %1209 = vmatpush1.bf16.msra.mxu1 %v2138_v43  ;;  %1309 = vmatpush1.bf16.msra.mxu0 %v2139_v17  ;;  %v231_v43 = vlaneseq }
  0xa2   :  { %1211 = vmatprep.subr.bf16.mxu1 %v2140_v2  ;;  %1311 = vmatprep.subr.bf16.mxu0 %v2141_v1 }
  0xa3   :  { %v232_v17 = vshrl.u32 %v231_v43, 7 }
  0xa5   :  { %1213 = vmatpush1.bf16.msra.mxu1 %v2142_v33  ;;  %1313 = vmatpush1.bf16.msra.mxu0 %v2143_v58  ;;  %v233_v2 = vsub.s32 0, %v232_v17  ;;  %v237_v1 = vsub.s32 1, %v232_v17 }
  0xa6   :  { %1215 = vmatprep.subr.bf16.mxu1 %v2144_v25  ;;  %1315 = vmatprep.subr.bf16.mxu0 %v2145_v63 }
  0xa9   :  { %1217 = vmatpush1.bf16.msra.mxu1 %v2146_v34  ;;  %1317 = vmatpush1.bf16.msra.mxu0 %v2147_v31 }
  0xaa   :  { %1219 = vmatprep.subr.bf16.mxu1 %v2148_v11  ;;  %1319 = vmatprep.subr.bf16.mxu0 %v2149_v38 }
  0xad   :  { %1221 = vmatpush1.bf16.msra.mxu1 %v2150_v12  ;;  %1321 = vmatpush1.bf16.msra.mxu0 %v2151_v14 }
  0xae   :  { %1223 = vmatprep.subr.bf16.mxu1 %v1828_v32  ;;  %1323 = vmatprep.subr.bf16.mxu0 %v2152_v28  ;;  %v2155_v32 = vpack.c.bf16 %v1546_v59, %v1535_v54  ;;  %v2160_v54 = vld [vmem:[#allocation6_spill] sm:$0xff]  ;;  %v2161_v59 = vpack.c.bf16 %v1525_v49, %v1523_v48  ;;  %v2167_v48 = vpack.c.bf16 %v1599_v18, %v1570_v13  ;;  %v2174_v13 = vld [vmem:[#allocation16_spill] sm:$0xff] }
  0xaf   :  { %v2168_v49 = vld [vmem:[#allocation10_spill] sm:$0xff] }
  0xb0   :  { %v2175_v18 = vld [vmem:[#allocation14_spill] sm:$0xff] }
  0xb1   :  { %1225 = vmatpush1.bf16.msra.mxu1 %v1834_v35  ;;  %1325 = vmatpush1.bf16.msra.mxu0 %v1830_v45  ;;  %v2157_v45 = vpack.c.bf16 %v1503_v40, %v1501_v39  ;;  %v2158_v35 = vld [vmem:[#allocation5_spill] sm:$0xff]  ;;  %v2162_v39 = vld [vmem:[#allocation7_spill] sm:$0xff]  ;;  %v2163_v40 = vpack.c.bf16 %v1541_v56, %v1527_v50  ;;  %v2169_v50 = vpack.c.bf16 %v1608_v24, %v1601_v19 }
  0xb2   :  { %1227 = vmatprep.subr.bf16.mxu1 %v1842_v27  ;;  %1327 = vmatprep.subr.bf16.mxu0 %v2153_v61  ;;  %v2159_v27 = vpack.c.bf16 %v1514_v44, %v1505_v41  ;;  %v2165_v41 = vpack.c.bf16 %v1560_v3, %v1548_v60  ;;  %v2166_v44 = vld [vmem:[#allocation9_spill] sm:$0xff]  ;;  %v2170_v56 = vld [vmem:[#allocation11_spill] sm:$0xff]  ;;  %v2172_v60 = vld [vmem:[#allocation12_spill] sm:$0xff]  ;;  %v2173_v3 = vpack.c.bf16 %v1636_v52, %v1624_v37 }
  0xb3   :  { %v2177_v62 = vpack.c.bf16 %v2175_v18, %v2176_v23  ;;  %v2178_v19 = vld [vmem:[#allocation19_spill] sm:$0xff]  ;;  %v2179_v24 = vld [vmem:[#allocation17_spill] sm:$0xff]  ;;  %v2186_v37 = vld [vmem:[#allocation24_spill] sm:$0xff] }
  0xb4   :  { %1021 = vmatmul.mubr.f32.vlgmr.msra.gmra.mrb[0].mxu0 %v1906_v46  ;;  %v2181_v15 = vpack.c.bf16 %v2179_v24, %v2180_v0  ;;  %v2187_v52 = vld [vmem:[#allocation23_spill] sm:$0xff] }
  0xb5   :  { %1229 = vmatpush1.bf16.msra.mxu1 %v1846_v7  ;;  %1329 = vmatpush1.bf16.msra.mxu0 %v2154_v55  ;;  %v2164_v7 = vld [vmem:[#allocation8_spill] sm:$0xff]  ;;  %v2189_v20 = vpack.c.bf16 %v2187_v52, %v2188_v26 }
  0xb6   :  { %1026 = vmatprep.mubr.f32.mxu0 %v2133_v8  ;;  %1231 = vmatprep.subr.bf16.mxu1 %v2155_v32 }
  0xb7   :  { %1331 = vmatprep.subr.bf16.mxu0 %v2156_v10 }
  0xb8   :  { %586 = vmatmul.mubr.f32.vlgmr.msra.gmra.mrb[0].mxu1 %v1906_v46  ;;  %1028 = vmatmul.mubr.f32.gmra.mrb[2].mxu0 %v1912_v5 }
  0xb9   :  { %1233 = vmatpush1.bf16.msra.mxu1 %v2157_v45  ;;  %1333 = vmatpush1.bf16.msra.mxu0 %v2158_v35 }
  0xba   :  { %591 = vmatprep.mubr.f32.mxu1 %v2133_v8  ;;  %1235 = vmatprep.subr.bf16.mxu1 %v2159_v27 }
  0xbb   :  { %1335 = vmatprep.subr.bf16.mxu0 %v2160_v54  ;;  %1130 = vmatprep.mubr.f32.mxu0 %v2133_v8 }
  0xbc   :  { %593 = vmatmul.mubr.f32.gmra.mrb[2].mxu1 %v1912_v5 }
  0xbd   :  { %1237 = vmatpush1.bf16.msra.mxu1 %v2161_v59  ;;  %1337 = vmatpush1.bf16.msra.mxu0 %v2162_v39 }
  0xbe   :  { %1239 = vmatprep.subr.bf16.mxu1 %v2163_v40  ;;  %1339 = vmatprep.subr.bf16.mxu0 %v2164_v7 }
  0xbf   :  { %727 = vmatprep.mubr.f32.mxu1 %v2133_v8 }
  0xc1   :  { %1241 = vmatpush1.bf16.msra.mxu1 %v2165_v41  ;;  %1341 = vmatpush1.bf16.msra.mxu0 %v2166_v44 }
  0xc2   :  { %1243 = vmatprep.subr.bf16.mxu1 %v2167_v48  ;;  %1343 = vmatprep.subr.bf16.mxu0 %v2168_v49 }
  0xc5   :  { %1245 = vmatpush1.bf16.msra.mxu1 %v2169_v50  ;;  %1345 = vmatpush1.bf16.msra.mxu0 %v2170_v56 }
  0xc6   :  { %1247 = vmatprep.subr.bf16.mxu1 %v2171_v22  ;;  %1347 = vmatprep.subr.bf16.mxu0 %v2172_v60 }
  0xc9   :  { %1249 = vmatpush1.bf16.msra.mxu1 %v2173_v3  ;;  %1349 = vmatpush1.bf16.msra.mxu0 %v2174_v13 }
  0xca   :  { %1251 = vmatprep.subr.bf16.mxu1 %v2177_v62  ;;  %1351 = vmatprep.subr.bf16.mxu0 %v2178_v19 }
  0xcd   :  { %1253 = vmatpush1.bf16.msra.mxu1 %v2181_v15  ;;  %1353 = vmatpush1.bf16.msra.mxu0 %v2182_v30 }
  0xce   :  { %1255 = vmatprep.subr.bf16.mxu1 %v2185_v16  ;;  %1355 = vmatprep.subr.bf16.mxu0 %v2186_v37 }
  0xd1   :  { %1257 = vmatpush1.bf16.msra.mxu1 %v2189_v20  ;;  %1357 = vmatpush1.bf16.msra.mxu0 %v2190_v6 }
  0xd2   :  { %1259 = vmatprep.subr.bf16.mxu1 %v2193_v57 }
  0xd4   :  { %1132 = vmatmul.mubr.f32.vlgmr.msra.gmra.mrb[0].mxu0 %v1906_v46  ;;  %v229_v46 = vld [vmem:[%s2051_s3] sm:$0x3] }
  0xd5   :  { %1261 = vmatpush1.bf16.msra.mxu1 %v2196_v21  ;;  %1137 = vmatprep.mubr.f32.mxu0 %v2133_v8  ;;  %v234_v25 = vrot.slane %v229_v46, %v233_v2  ;;  %v238_v63 = vrot.slane %v229_v46, %v237_v1 }
  0xd8   :  { %730 = vmatmul.mubr.f32.vlgmr.msra.gmra.mrb[0].mxu1 %v1910_v9  ;;  %1139 = vmatmul.mubr.f32.gmra.mrb[2].mxu0 %v1912_v5 }
  0xd9   :  { %735 = vmatprep.mubr.f32.mxu1 %v2133_v8 }
  0xdc   :  { %738 = vmatmul.mubr.f32.gmra.mrb[2].mxu1 %v1917_v51 }
 0x1a7   :  { %v1133_v33 = vpop.f32.mrb[0].mxu0 }
 0x1a8   :  { %v1135_v58 = vpop.f32.mrb[1].mxu0 }
 0x1ab   :  { %v731_v34 = vpop.f32.mrb[0].mxu1  ;;  %v1140_v9 = vpop.f32.mrb[2].mxu0 }
 0x1ac   :  { %v1358_v31 = vadd.f32 %v731_v34, %v234_v25  ;;  %v733_v5 = vpop.f32.mrb[1].mxu1  ;;  %v1142_v11 = vpop.f32.mrb[3].mxu0 }
 0x1ad   :  { %v1360_v8 = vadd.f32 %v733_v5, %v238_v63 }
 0x1ae   :  { %v1359_v38 = vadd.f32 %v1358_v31, %v1133_v33 }
 0x1af   :  { %v1361_v51 = vadd.f32 %v1360_v8, %v1135_v58  ;;  %v739_v12 = vpop.f32.mrb[2].mxu1 }
 0x1b0   :  { %v1145_v14 = vmax.f32 %v1359_v38, 0.0  ;;  %v1362_v28 = vadd.f32 %v739_v12, %v234_v25  ;;  %v741_v61 = vpop.f32.mrb[3].mxu1 }
 0x1b1   :  { %v1146_v55 = vmax.f32 %v1361_v51, 0.0  ;;  %v1364_v32 = vadd.f32 %v741_v61, %v238_v63 }
 0x1b2   :  { %1149 = vst [vmem:[%s2052_s4] sm:$0xff] %v1145_v14  ;;  %v1363_v10 = vadd.f32 %v1362_v28, %v1140_v9 }
 0x1b3   :  { %1150 = vst [vmem:[%s2052_s4 + $0x8] sm:$0xff] %v1146_v55  ;;  %v1365_v45 = vadd.f32 %v1364_v32, %v1142_v11 }
 0x1b4   :  { %v1147_v35 = vmax.f32 %v1363_v10, 0.0 }
 0x1b5   :  { %v1148_v27 = vmax.f32 %v1365_v45, 0.0 }
 0x1b6   :  { %1151 = vst [vmem:[%s2052_s4 + $0x10] sm:$0xff] %v1147_v35 }
 0x1b7   :  { %1152 = vst [vmem:[%s2052_s4 + $0x18] sm:$0xff] %v1148_v27 }

</bundles_post_ra>
